<compile_context>
chip_gen: v6e
topology: v6e:2x2x1
jax: 0.10.0
libtpu: 0.0.40
codegen_flags: <defaults>
</compile_context>

<pallas_src>
import functools

import jax
import jax.numpy as jnp
from jax.experimental import pallas as pl
from jax.experimental.pallas import tpu as pltpu


_VMEM_LIMIT = 32 * 1024 * 1024          # scoped-VMEM ceiling safe on v5e/v6e/v7x
_DEFAULT_TILE_BYTES = 4 * 1024 * 1024   # f32 bytes of x per row tile
_DEFAULT_FUSED_BYTES = 2 * 1024 * 1024  # x (as f32) below this -> fused single kernel


def _round_up(a: int, b: int) -> int:
    return ((a + b - 1) // b) * b


def _choose_row_tile(n: int, c: int, tile_budget_bytes: int) -> int:
    rows = max(8, (max(tile_budget_bytes, 1) // (c * 4)) // 8 * 8)
    # Keep >= 2 grid steps so the "parallel" axes can feed both v7x TensorCores.
    rows = min(rows, _round_up(max(1, (n + 1) // 2), 8))
    if rows >= n:
        return n            # single full-extent tile (always a legal block)
    return rows             # multiple of 8; ragged last tile handled in-kernel


# --------------------------------------------------------------------------
# Fused fast path: whole problem resident in VMEM (1 read + 1 write of x).
# --------------------------------------------------------------------------
def _fused_kernel(x_ref, g_ref, b_ref, o_ref, *, s, eps):
    x = x_ref[...].astype(jnp.float32)                        # (N, C)
    mean = jnp.mean(x, axis=0, keepdims=True)
    xc = x - mean
    var = jnp.mean(xc * xc, axis=0, keepdims=True)            # biased (training BN)
    y = xc * (g_ref[...] * jax.lax.rsqrt(var + eps)) + b_ref[...]
    denom = jnp.sum(y, axis=1, keepdims=True)                  # (N, 1)
    o_ref[...] = (y * (s * pl.reciprocal(denom, approx=False))).astype(o_ref.dtype)


# --------------------------------------------------------------------------
# Pass 1 (tiled path): per-core-slice partial (mean, M2), Chan/Welford combine
# across row tiles.  Grid = (2 core-slices [parallel], tiles [arbitrary]).
# --------------------------------------------------------------------------
def _stats_kernel(x_ref, mean_ref, m2_ref, *, n, tn, half):
    p = pl.program_id(0)
    i = pl.program_id(1)

    @pl.when(i == 0)
    def _():
        mean_ref[...] = jnp.zeros_like(mean_ref)
        m2_ref[...] = jnp.zeros_like(m2_ref)

    tile_start = (p * half + i) * tn
    core_start = p * half * tn
    rows_i = jnp.clip(n - tile_start, 0, tn)          # valid rows in this tile
    prev_i = jnp.clip(n - core_start, 0, i * tn)      # rows already folded (this core)
    rows = rows_i.astype(jnp.float32)
    prev = prev_i.astype(jnp.float32)

    x = x_ref[...].astype(jnp.float32)                # (tn, C), native-dtype DMA
    valid = jax.lax.broadcasted_iota(jnp.int32, x.shape, 0) < rows_i
    xm = jnp.where(valid, x, 0.0)

    safe_rows = jnp.maximum(rows, 1.0)
    t_mean = jnp.sum(xm, axis=0, keepdims=True) / safe_rows      # (1, C)
    dx = jnp.where(valid, x - t_mean, 0.0)
    t_m2 = jnp.sum(dx * dx, axis=0, keepdims=True)               # (1, C)

    total = jnp.maximum(prev + rows, 1.0)
    delta = t_mean - mean_ref[...]                               # -> (1, 8, C)
    mean_ref[...] = mean_ref[...] + delta * (rows / total)
    m2_ref[...] = m2_ref[...] + t_m2 + delta * delta * (prev * rows / total)


# --------------------------------------------------------------------------
# Pass 2 (tiled path): y = x*scale + shift; out = y * (s / row_sum(y)).
# --------------------------------------------------------------------------
def _apply_kernel(x_ref, scale_ref, shift_ref, o_ref, *, s):
    x = x_ref[...].astype(jnp.float32)                # (tn, C)
    y = x * scale_ref[...] + shift_ref[...]           # folded BN affine
    denom = jnp.sum(y, axis=1, keepdims=True)         # (tn, 1) XLU lane reduce
    o_ref[...] = (y * (s * pl.reciprocal(denom, approx=False))).astype(o_ref.dtype)


def vector_sum_as(x, gamma, beta, *, s=1.0, eps=1e-5,
                  max_fused_bytes=_DEFAULT_FUSED_BYTES,
                  tile_budget_bytes=_DEFAULT_TILE_BYTES):
    """x: (N, C); gamma, beta: (C,).  Returns (N, C) in x.dtype."""
    n, c = x.shape
    out_dtype = x.dtype
    g2 = gamma.astype(jnp.float32).reshape(1, c)
    b2 = beta.astype(jnp.float32).reshape(1, c)

    # ---- Fused single-kernel path for VMEM-resident problems ---------------
    if n * c * 4 <= max_fused_bytes:
        return pl.pallas_call(
            functools.partial(_fused_kernel, s=float(s), eps=float(eps)),
            out_shape=jax.ShapeDtypeStruct((n, c), out_dtype),
            compiler_params=pltpu.CompilerParams(vmem_limit_bytes=_VMEM_LIMIT),
        )(x, g2, b2)

    # ---- Tiled two-pass path ------------------------------------------------
    tn = _choose_row_tile(n, c, tile_budget_bytes)
    n_tiles = -(-n // tn)
    half = (n_tiles + 1) // 2            # tiles per core slice in pass 1

    # Pass 1: per-core partial (mean, M2); resident output accumulators.
    mean_parts, m2_parts = pl.pallas_call(
        functools.partial(_stats_kernel, n=n, tn=tn, half=half),
        out_shape=(jax.ShapeDtypeStruct((2, 8, c), jnp.float32),
                   jax.ShapeDtypeStruct((2, 8, c), jnp.float32)),
        grid=(2, half),
        in_specs=[pl.BlockSpec(
            (tn, c), lambda p, i: (jnp.minimum(p * half + i, n_tiles - 1), 0))],
        out_specs=(pl.BlockSpec((1, 8, c), lambda p, i: (p, 0, 0)),
                   pl.BlockSpec((1, 8, c), lambda p, i: (p, 0, 0))),
        compiler_params=pltpu.CompilerParams(
            dimension_semantics=("parallel", "arbitrary"),
            vmem_limit_bytes=_VMEM_LIMIT),
    )(x)

    # Combine the two partials + fold the BN affine (tiny (C,)-sized jnp math).
    n0 = float(min(n, half * tn))
    n1 = float(n) - n0
    mean0, mean1 = mean_parts[0, 0], mean_parts[1, 0]
    m20, m21 = m2_parts[0, 0], m2_parts[1, 0]
    delta = mean1 - mean0
    mean = mean0 + delta * (n1 / float(n))
    var = (m20 + m21 + delta * delta * (n0 * n1 / float(n))) / float(n)  # biased
    scale = (g2[0] * jax.lax.rsqrt(var + float(eps))).reshape(1, c)
    shift = (b2[0] - mean * scale[0]).reshape(1, c)

    # Pass 2: normalize + row-sum division; rows parallel across cores.
    return pl.pallas_call(
        functools.partial(_apply_kernel, s=float(s)),
        out_shape=jax.ShapeDtypeStruct((n, c), out_dtype),
        grid=(n_tiles,),
        in_specs=[pl.BlockSpec((tn, c), lambda i: (i, 0)),
                  pl.BlockSpec((1, c), lambda i: (0, 0)),
                  pl.BlockSpec((1, c), lambda i: (0, 0))],
        out_specs=pl.BlockSpec((tn, c), lambda i: (i, 0)),
        compiler_params=pltpu.CompilerParams(
            dimension_semantics=("parallel",),
            vmem_limit_bytes=_VMEM_LIMIT),
    )(x, scale, shift)


def vector_sum_as_ref(x, gamma, beta, *, s=1.0, eps=1e-5):
    """Pure-JAX reference mirroring PyTorch training-mode semantics."""
    x = x.astype(jnp.float32)
    mean = jnp.mean(x, axis=0, keepdims=True)
    var = jnp.mean((x - mean) ** 2, axis=0, keepdims=True)
    y = gamma[None, :] * (x - mean) / jnp.sqrt(var + eps) + beta[None, :]
    return s * (y / jnp.sum(y, axis=1, keepdims=True))


if __name__ == "__main__":
    key = jax.random.PRNGKey(0)
    k_x, k_g, k_b = jax.random.split(key, 3)

    batch = 8
    norm_shape = 32   # channels (the BatchNorm1d feature dim)
    s = 1.0

    x = jax.random.normal(k_x, (batch, norm_shape), dtype=jnp.float32)
    # nn.BatchNorm1d default init is weight=1, bias=0; perturb deterministically
    # so the affine path is exercised.
    gamma = 1.0 + 0.1 * jax.random.normal(k_g, (norm_shape,), dtype=jnp.float32)
    beta = 0.1 * jax.random.normal(k_b, (norm_shape,), dtype=jnp.float32)

    out = vector_sum_as(x, gamma, beta, s=s)            # fused fast path
    out = jax.block_until_ready(out)
    ref = vector_sum_as_ref(x, gamma, beta, s=s)
    assert out.shape == (batch, norm_shape)
    assert jnp.allclose(out, ref, atol=1e-5, rtol=1e-5), "mismatch (fused path)"

    # Exercise the tiled two-pass path (ragged last tile, masked stats,
    # two-core partial-stats combine) by forcing tiny row tiles.
    k2_x, k2_g, k2_b = jax.random.split(jax.random.PRNGKey(1), 3)
    n2, c2 = 37, 40
    x2 = jax.random.normal(k2_x, (n2, c2), dtype=jnp.float32)
    gamma2 = 1.0 + 0.1 * jax.random.normal(k2_g, (c2,), dtype=jnp.float32)
    beta2 = 1.0 + 0.05 * jax.random.normal(k2_b, (c2,), dtype=jnp.float32)
    out2 = vector_sum_as(x2, gamma2, beta2, s=0.5,
                         max_fused_bytes=0, tile_budget_bytes=8 * c2 * 4)
    out2 = jax.block_until_ready(out2)
    ref2 = vector_sum_as_ref(x2, gamma2, beta2, s=0.5)
    assert out2.shape == (n2, c2)
    assert jnp.allclose(out2, ref2, atol=1e-4, rtol=1e-4), "mismatch (tiled path)"

    print("KERNEL_OK")
</pallas_src>

<mosaic_0001>
module attributes {stable_mosaic.version = 11 : i64} {
  func.func @_fused_kernel(%arg0: memref<8x32xf32, #tpu.memory_space<vmem>>, %arg1: memref<1x32xf32, #tpu.memory_space<vmem>>, %arg2: memref<1x32xf32, #tpu.memory_space<vmem>>, %arg3: memref<8x32xf32, #tpu.memory_space<vmem>>) attributes {dimension_semantics = [], scalar_prefetch = 0 : i64, scratch_operands = 0 : i64, tpu.core_type = #tpu.core_type<tc>} {
    %c0 = arith.constant 0 : index
    %c0_0 = arith.constant 0 : index
    %0 = vector.load %arg0[%c0, %c0_0] : memref<8x32xf32, #tpu.memory_space<vmem>>, vector<8x32xf32>
    %cst = arith.constant dense<0.000000e+00> : vector<32xf32>
    %1 = vector.multi_reduction <add>, %0, %cst [0] : vector<8x32xf32> to vector<32xf32>
    %2 = vector.shape_cast %1 : vector<32xf32> to vector<1x32xf32>
    %cst_1 = arith.constant 8.000000e+00 : f32
    %3 = vector.broadcast %cst_1 : f32 to vector<1x32xf32>
    %4 = arith.divf %2, %3 : vector<1x32xf32>
    %5 = vector.broadcast %4 : vector<1x32xf32> to vector<8x32xf32>
    %6 = arith.subf %0, %5 : vector<8x32xf32>
    %7 = arith.mulf %6, %6 : vector<8x32xf32>
    %cst_2 = arith.constant dense<0.000000e+00> : vector<32xf32>
    %8 = vector.multi_reduction <add>, %7, %cst_2 [0] : vector<8x32xf32> to vector<32xf32>
    %9 = vector.shape_cast %8 : vector<32xf32> to vector<1x32xf32>
    %cst_3 = arith.constant 8.000000e+00 : f32
    %10 = vector.broadcast %cst_3 : f32 to vector<1x32xf32>
    %11 = arith.divf %9, %10 : vector<1x32xf32>
    %c0_4 = arith.constant 0 : index
    %c0_5 = arith.constant 0 : index
    %12 = vector.load %arg1[%c0_4, %c0_5] : memref<1x32xf32, #tpu.memory_space<vmem>>, vector<1x32xf32>
    %cst_6 = arith.constant 9.99999974E-6 : f32
    %13 = vector.broadcast %cst_6 : f32 to vector<1x32xf32>
    %14 = arith.addf %11, %13 : vector<1x32xf32>
    %15 = math.rsqrt %14 : vector<1x32xf32>
    %16 = arith.mulf %12, %15 : vector<1x32xf32>
    %17 = vector.broadcast %16 : vector<1x32xf32> to vector<8x32xf32>
    %18 = arith.mulf %6, %17 : vector<8x32xf32>
    %c0_7 = arith.constant 0 : index
    %c0_8 = arith.constant 0 : index
    %19 = vector.load %arg2[%c0_7, %c0_8] : memref<1x32xf32, #tpu.memory_space<vmem>>, vector<1x32xf32>
    %20 = vector.broadcast %19 : vector<1x32xf32> to vector<8x32xf32>
    %21 = arith.addf %18, %20 : vector<8x32xf32>
    %cst_9 = arith.constant dense<0.000000e+00> : vector<8xf32>
    %22 = vector.multi_reduction <add>, %21, %cst_9 [1] : vector<8x32xf32> to vector<8xf32>
    %23 = vector.shape_cast %22 : vector<8xf32> to vector<8x1xf32>
    %24 = tpu.reciprocal %23 : vector<8x1xf32> -> vector<8x1xf32>
    %cst_10 = arith.constant 1.000000e+00 : f32
    %25 = vector.broadcast %cst_10 : f32 to vector<8x1xf32>
    %26 = arith.mulf %25, %24 : vector<8x1xf32>
    %27 = vector.broadcast %26 : vector<8x1xf32> to vector<8x32xf32>
    %28 = arith.mulf %21, %27 : vector<8x32xf32>
    %c0_11 = arith.constant 0 : index
    %c0_12 = arith.constant 0 : index
    %29 = vector.load %arg3[%c0_11, %c0_12] : memref<8x32xf32, #tpu.memory_space<vmem>>, vector<8x32xf32>
    tpu.vector_store %arg3[%c0_11, %c0_12], %28 {strides = array<i32>} : memref<8x32xf32, #tpu.memory_space<vmem>>, vector<8x32xf32>,
    return
  }
}

</mosaic_0001>

<bundles_post_ra>
// kernel: tpu_custom_call.1
= control target key start
LH: loop header
LB: loop body
LE: loop exit
PB: predicated region body
PF: predicated region fallthrough
CT: control target
= control target key end

     0   :  { %8 = vsyncpa [#allocation3], 0  ;;  %s177_s0 = inlined_call_operand.hbm [shape: f32[8,32], index: 0, kind: input, shape index: {}]   ;;  %s178_s1 = inlined_call_operand.vmem [shape: f32[1,32], index: 1, kind: input, shape index: {}]   ;;  %s179_s2 = inlined_call_operand.vmem [shape: f32[1,32], index: 2, kind: input, shape index: {}]   ;;  %s180_s3 = inlined_call_operand.hbm [shape: f32[8,32], index: 3, kind: output, shape index: {}]  }
   0x1   :  { %9 = vsyncpa [#allocation4], 0  ;;  %s139_s12 = smov [#allocation2]  }
   0x2   :  { %s16_s13 = sshll.u32 %s139_s12, 4  ;;  %s17_s13 = int_to_ptr.vmem [resolvable:$true] %s16_s13 }
   0x3   :  { %s103_s14 = scalar_lea.vmem %s17_s13, 128  ;;  %p108_p1 = scmp.lt.s32.totalorder %s17_s13, %s17_s13 }
   0x4   :  { %p104_p0 = scmp.ne.s32.totalorder %s17_s13, %s103_s14  ;;  %p109_p2 = scmp.lt.s32.totalorder %s103_s14, %s103_s14 }
   0x6   :  { %p110_p3 = por %p109_p2, %p108_p1 }
   0x8   :  { %p111_p4 = pnand %p110_p3, %p104_p0 }
   0xa   :  { %114 = shalt.err (!%p111_p4)
}
   0xb   :  { %19 = dma.hbm_to_vmem [thread:$0]  %s177_s0, 128, %s17_s13, [#allocation3]  }
   0xc   :  { %135 = dma.done.wait [#allocation3], 128  }
   0xd   :  { %136 = vsyncadd [#allocation3], 4294967168  ;;  %vm28_vm0 = vcmask 261120   ;;  %v27_v0 = vld [vmem:[#allocation2] sm:$0xff]  ;;  %v53_v20 = vlaneseq  ;;  %s140_s20 = smov [#allocation5]  }
   0xe   :  { %v29_v1 = vsel %vm28_vm0, %v27_v0, 0.0  ;;  %v48_v22 = vld [vmem:[%s178_s1] sm:$0x1]  ;;  %s79_s21 = sshll.u32 %s140_s20, 4  ;;  %s80_s21 = int_to_ptr.vmem [resolvable:$true] %s79_s21 }
   0xf   :  { %v30_v2 = vrot.slane %v29_v1, 4  ;;  %v54_v21 = vshrl.u32 %v53_v20, 7  ;;  %v88_v27 = vld [vmem:[%s179_s2] ss:$0 sm:$0xff]  ;;  %s115_s1 = scalar_lea.vmem %s80_s21, 128  ;;  %p120_p6 = scmp.lt.s32.totalorder %s80_s21, %s80_s21 }
  0x10   :  { %p116_p5 = scmp.ne.s32.totalorder %s80_s21, %s115_s1  ;;  %p121_p7 = scmp.lt.s32.totalorder %s115_s1, %s115_s1 }
  0x11   :  { %v31_v3 = vadd.f32 %v30_v2, %v29_v1  ;;  %v55_v23 = vsub.s32 0, %v54_v21 }
  0x12   :  { %p122_p8 = por %p121_p7, %p120_p6 }
  0x13   :  { %v32_v4 = vrot.slane %v31_v3, 2 }
  0x14   :  { %p123_p9 = pnand %p122_p8, %p116_p5 }
  0x15   :  { %v33_v5 = vadd.f32 %v32_v4, %v31_v3 }
  0x17   :  { %v34_v6 = vrot.slane %v33_v5, 1 }
  0x19   :  { %v35_v7 = vadd.f32 %v34_v6, %v33_v5 }
  0x1b   :  { %v37_v8 = vmul.f32 0.125, %v35_v7 }
  0x1d   :  { %v38_v9 = vsub.f32 %v27_v0, %v37_v8 }
  0x1f   :  { %v39_v10 = vmul.f32 %v38_v9, %v38_v9 }
  0x21   :  { %v40_v11 = vsel %vm28_vm0, %v39_v10, 0.0 }
  0x22   :  { %v41_v12 = vrot.slane %v40_v11, 4 }
  0x24   :  { %v42_v13 = vadd.f32 %v41_v12, %v40_v11 }
  0x26   :  { %v43_v14 = vrot.slane %v42_v13, 2 }
  0x28   :  { %v44_v15 = vadd.f32 %v43_v14, %v42_v13 }
  0x2a   :  { %v45_v16 = vrot.slane %v44_v15, 1 }
  0x2c   :  { %v46_v17 = vadd.f32 %v45_v16, %v44_v15 }
  0x2e   :  { %v47_v18 = vmul.f32 0.125, %v46_v17 }
  0x30   :  { %v49_v19 = vadd.f32 1e-05, %v47_v18 }
  0x32   :  { %91 = vrsqrt.f32 %v49_v19 }
  0x3f   :  { %v92_v24 = vpop.eup %91 }
  0x40   :  { %v51_v25 = vmul.f32 %v92_v24, %v48_v22 }
  0x42   :  { %v56_v26 = vrot.slane %v51_v25, %v55_v23 }
  0x44   :  { %v58_v28 = vmul.f32 %v56_v26, %v38_v9 }
  0x46   :  { %v66_v29 = vadd.f32 %v88_v27, %v58_v28 }
  0x48   :  { %v67_v30 = vsel %vm28_vm0, %v66_v29, 0.0 }
  0x49   :  { %68 = vadd.xlane.f32.xlu0 %v67_v30 }
  0xd2   :  { %v69_v31 = vpop.xlane.xlu0 %68 }
  0xd3   :  { %93 = vrcp.f32 %v69_v31 }
  0xe0   :  { %v94_v32 = vpop.eup %93 }
  0xe1   :  { %v71_v33 = vmul.f32 %v94_v32, %v66_v29 }
  0xe3   :  { %72 = vst.msk [vmem:[#allocation5] sm:$0xff] %vm28_vm0, %v71_v33 }
  0xe4   :  { %126 = shalt.err (!%p123_p9)
}
  0xe5   :  { %82 = dma.vmem_to_hbm [thread:$0]  %s80_s21, 128, %s180_s3, [#allocation4]  }
  0xe6   :  { %137 = dma.done.wait [#allocation4], 128  }
  0xe7   :  { %138 = vsyncadd [#allocation4], 4294967168 }
  0xe8   :  { %86 = vsyncpa [#allocation3], 1 }
  0xe9   :  { %87 = vsyncpa [#allocation4], 1 }

</bundles_post_ra>
